<compile_context>
chip_gen: v7x
topology: tpu7x:2x2x1
jax: 0.10.0
libtpu: 0.0.40
codegen_flags: <defaults>
</compile_context>

<pallas_src>
import jax
import jax.numpy as jnp
from jax.experimental import pallas as pl
from jax.experimental.pallas import tpu as pltpu


def autopad(k, p=None, d=1):
    """Pad to 'same' shape outputs (mirror of the PyTorch helper)."""
    if d > 1:
        k = d * (k - 1) + 1 if isinstance(k, int) else [d * (x - 1) + 1 for x in k]
    if p is None:
        p = k // 2 if isinstance(k, int) else [x // 2 for x in k]
    return p


def _default_tile_len(Lout, stride, C_in, C_out, K,
                      vmem_budget=48 * 1024 * 1024):
    """Largest lane-dense (multiple-of-128) output tile fitting the VMEM budget."""
    if Lout <= 512:
        return Lout  # single tile; full-dim exemption covers widths < 128
    # double-buffered x0/x1 + out, plus slab scratch + f32 acc (worst case f32 DMAs)
    per_lane = 4 * (2 * 2 * C_in * stride + 2 * C_out + 2 * C_in * stride + C_out)
    tl = (vmem_budget // max(per_lane, 1)) // 128 * 128
    tl = max(128, min(tl, 2048))
    return int(min(tl, pl.cdiv(Lout, 128) * 128))


def _make_kernel(C_in, C_out, K, TL, TLin, stride, dilation, need_x1, act,
                 compute_dtype):
    span = (TL - 1) * stride + 1

    def body(x0_ref, x1_ref, w_ref, b_ref, o_ref, slab_ref):
        if need_x1:
            # Assemble the haloed input window from two adjacent, lane-dense
            # blocks (offsets are multiples of TLin, so the stores are aligned).
            slab_ref[:, :TLin] = x0_ref[0].astype(compute_dtype)
            slab_ref[:, TLin:] = x1_ref[0].astype(compute_dtype)
            slab = slab_ref[...]
        else:
            slab = x0_ref[0].astype(compute_dtype)

        acc = None
        for j in range(K):  # static unrolled loop over kernel taps
            start = j * dilation
            xs = jax.lax.slice(slab, (0, start), (C_in, start + span),
                               (1, stride))            # (C_in, TL)
            part = jnp.dot(w_ref[j], xs,               # (C_out, C_in) @ (C_in, TL)
                           preferred_element_type=jnp.float32)
            acc = part if acc is None else acc + part

        y = acc + b_ref[...]                           # BN shift (scale folded in W)
        if act:
            y = y * jax.nn.sigmoid(y)                  # SiLU
        o_ref[0] = y.astype(o_ref.dtype)

    if need_x1:
        def kernel(x0_ref, x1_ref, w_ref, b_ref, o_ref, slab_ref):
            body(x0_ref, x1_ref, w_ref, b_ref, o_ref, slab_ref)
    else:
        def kernel(x0_ref, w_ref, b_ref, o_ref):
            body(x0_ref, None, w_ref, b_ref, o_ref, None)
    return kernel


def conv_bn_act(x, w, gamma, beta, running_mean, running_var, *,
                stride=1, dilation=1, padding=None, eps=1e-5,
                act=True, compute_dtype=jnp.bfloat16, tl=None):
    """x: (N, C_in, L)  w: (C_out, C_in, K)  BN params: (C_out,)."""
    N, C_in, L = x.shape
    C_out, C_in_w, K = w.shape
    assert C_in_w == C_in, "groups != 1 not supported"  # TODO(synk): groups

    p = autopad(K, padding, dilation)
    Lout = (L + 2 * p - dilation * (K - 1) - 1) // stride + 1

    # ---- fold BatchNorm (eval mode) into the weights + a per-channel shift
    scale = gamma / jnp.sqrt(running_var + eps)
    shift = (beta - running_mean * scale).reshape(C_out, 1).astype(jnp.float32)
    # (C_out, C_in, K) -> (K, C_out, C_in): each tap is a lane-dense slab.
    w_taps = (w * scale[:, None, None]).transpose(2, 0, 1).astype(compute_dtype)

    # ---- lane-dense output tile, sized to the VMEM budget
    TL = int(tl) if tl is not None else _default_tile_len(Lout, stride, C_in,
                                                          C_out, K)
    num_t = pl.cdiv(Lout, TL)
    if num_t == 1:
        TL = Lout
    span = (TL - 1) * stride + 1
    if num_t == 1:
        TLin = max(span + (K - 1) * dilation, L + p)
        need_x1 = False
    else:
        assert TL % 128 == 0, "tile length must be a multiple of 128 when tiling"
        TLin = TL * stride
        need_x1 = (span + (K - 1) * dilation) > TLin
        assert span + (K - 1) * dilation <= 2 * TLin, "halo larger than one tile"

    # Pad left for 'same' conv; pad right to whole input tiles (+1 halo tile).
    Lx = max(num_t + int(need_x1), pl.cdiv(L + p, TLin)) * TLin
    x_pad = jnp.pad(x, ((0, 0), (0, 0), (p, Lx - L - p)))

    kernel = _make_kernel(C_in, C_out, K, TL, TLin, stride, dilation, need_x1,
                          act, compute_dtype)

    in_specs = [pl.BlockSpec((1, C_in, TLin), lambda n, t: (n, 0, t))]
    inputs = [x_pad]
    if need_x1:
        in_specs.append(pl.BlockSpec((1, C_in, TLin), lambda n, t: (n, 0, t + 1)))
        inputs.append(x_pad)
    in_specs += [pl.BlockSpec((K, C_out, C_in), lambda n, t: (0, 0, 0)),
                 pl.BlockSpec((C_out, 1), lambda n, t: (0, 0))]
    inputs += [w_taps, shift]

    scratch_shapes = ([pltpu.VMEM((C_in, 2 * TLin), compute_dtype)]
                      if need_x1 else [])

    ib = jnp.dtype(x.dtype).itemsize
    cb = jnp.dtype(compute_dtype).itemsize
    est = (2 * (1 + int(need_x1)) * C_in * TLin * ib     # pipelined x tiles
           + 2 * C_out * TL * ib                         # pipelined out tiles
           + 2 * K * C_out * C_in * cb + 2 * C_out * 4   # weights + shift
           + 2 * C_in * TLin * cb                        # slab scratch
           + 2 * C_out * TL * 4 + C_in * TL * cb)        # f32 acc + tap temp
    vmem_limit = int(min(112 * 1024 * 1024, max(32 * 1024 * 1024, 2 * est)))

    return pl.pallas_call(
        kernel,
        out_shape=jax.ShapeDtypeStruct((N, C_out, Lout), x.dtype),
        grid=(N, num_t),
        in_specs=in_specs,
        out_specs=pl.BlockSpec((1, C_out, TL), lambda n, t: (n, 0, t)),
        scratch_shapes=scratch_shapes,
        compiler_params=pltpu.CompilerParams(
            dimension_semantics=("parallel", "parallel"),
            vmem_limit_bytes=vmem_limit),
    )(*inputs)


def conv_bn_act_ref(x, w, gamma, beta, running_mean, running_var, *,
                    stride=1, dilation=1, padding=None, eps=1e-5, act=True):
    """Pure-JAX reference (lax conv) for correctness checks."""
    K = w.shape[-1]
    p = autopad(K, padding, dilation)
    out = jax.lax.conv_general_dilated(
        x.astype(jnp.float32), w.astype(jnp.float32),
        window_strides=(stride,), padding=[(p, p)],
        rhs_dilation=(dilation,),
        dimension_numbers=("NCH", "OIH", "NCH"))
    scale = (gamma / jnp.sqrt(running_var + eps)).reshape(1, -1, 1)
    shift = (beta - running_mean * gamma /
             jnp.sqrt(running_var + eps)).reshape(1, -1, 1)
    y = out * scale + shift
    if act:
        y = y * jax.nn.sigmoid(y)
    return y.astype(x.dtype)


if __name__ == "__main__":
    def make_inputs(key, N, C1, C2, L, K):
        kx, kw, kg, kb, km, kv = jax.random.split(key, 6)
        x = jax.random.normal(kx, (N, C1, L), dtype=jnp.float32)
        w = jax.random.normal(kw, (C2, C1, K), dtype=jnp.float32) * 0.1
        gamma = 1.0 + 0.1 * jax.random.normal(kg, (C2,), dtype=jnp.float32)
        beta = 0.1 * jax.random.normal(kb, (C2,), dtype=jnp.float32)
        rmean = 0.1 * jax.random.normal(km, (C2,), dtype=jnp.float32)
        rvar = jnp.abs(1.0 + 0.1 * jax.random.normal(kv, (C2,), dtype=jnp.float32))
        return x, w, gamma, beta, rmean, rvar

    cases = [
        # 1x1 conv, act=False — the qk/v/proj building block of MHGA1d.
        dict(N=2, C1=4, C2=8, L=16, K=1, s=1, d=1, act=False,
             cd=jnp.float32, tl=None, tol=1e-4),
        # k=3 'same' conv + SiLU, single-tile path.
        dict(N=2, C1=4, C2=8, L=16, K=3, s=1, d=1, act=True,
             cd=jnp.float32, tl=None, tol=1e-4),
        # k=3 conv, tiled Lout (halo path) + bf16 MXU inputs.
        dict(N=2, C1=8, C2=16, L=320, K=3, s=1, d=1, act=True,
             cd=jnp.bfloat16, tl=128, tol=5e-2),
    ]

    keys = jax.random.split(jax.random.PRNGKey(0), len(cases))
    for cfg, k in zip(cases, keys):
        x, w, g, b, rm, rv = make_inputs(k, cfg["N"], cfg["C1"], cfg["C2"],
                                         cfg["L"], cfg["K"])
        out = conv_bn_act(x, w, g, b, rm, rv,
                          stride=cfg["s"], dilation=cfg["d"], act=cfg["act"],
                          compute_dtype=cfg["cd"], tl=cfg["tl"])
        out = jax.block_until_ready(out)
        ref = conv_bn_act_ref(x, w, g, b, rm, rv,
                              stride=cfg["s"], dilation=cfg["d"], act=cfg["act"])
        assert out.shape == ref.shape, (out.shape, ref.shape)
        err = float(jnp.max(jnp.abs(out.astype(jnp.float32) -
                                    ref.astype(jnp.float32))))
        assert err <= cfg["tol"], (cfg, err)

    print("KERNEL_OK")
</pallas_src>

<mosaic_0001>
module attributes {stable_mosaic.version = 11 : i64} {
  func.func @kernel(%arg0: i32, %arg1: i32, %arg2: memref<1x4x16xf32, #tpu.memory_space<vmem>>, %arg3: memref<1x8x4xf32, #tpu.memory_space<vmem>>, %arg4: memref<8x1xf32, #tpu.memory_space<vmem>>, %arg5: memref<1x8x16xf32, #tpu.memory_space<vmem>>) attributes {dimension_semantics = [#tpu.dimension_semantics<parallel>, #tpu.dimension_semantics<parallel>], iteration_bounds = array<i64: 2, 1>, scalar_prefetch = 0 : i64, scratch_operands = 0 : i64, tpu.core_type = #tpu.core_type<tc>, window_params = [{transform_indices = @transform_0, window_bounds = array<i64: 1, 4, 16>}, {pipeline_mode = #tpu.pipeline_mode<synchronous>, transform_indices = @transform_1, window_bounds = array<i64: 1, 8, 4>}, {pipeline_mode = #tpu.pipeline_mode<synchronous>, transform_indices = @transform_2, window_bounds = array<i64: 8, 1>}, {transform_indices = @transform_3, window_bounds = array<i64: 1, 8, 16>}]} {
    %c0 = arith.constant 0 : index
    %c0_0 = arith.constant 0 : index
    %c0_1 = arith.constant 0 : index
    %0 = vector.load %arg2[%c0, %c0_0, %c0_1] : memref<1x4x16xf32, #tpu.memory_space<vmem>>, vector<1x4x16xf32>
    %1 = vector.shape_cast %0 : vector<1x4x16xf32> to vector<4x16xf32>
    %2 = vector.extract_strided_slice %1 {offsets = [0, 0], sizes = [4, 16], strides = [1, 1]} : vector<4x16xf32> to vector<4x16xf32>
    %c0_2 = arith.constant 0 : index
    %c0_3 = arith.constant 0 : index
    %c0_4 = arith.constant 0 : index
    %3 = vector.load %arg3[%c0_2, %c0_3, %c0_4] : memref<1x8x4xf32, #tpu.memory_space<vmem>>, vector<1x8x4xf32>
    %4 = vector.shape_cast %3 : vector<1x8x4xf32> to vector<8x4xf32>
    %cst = arith.constant dense<0.000000e+00> : vector<8x16xf32>
    %5 = tpu.matmul %4, %2, %cst {dimension_numbers = #tpu.dot_dimension_numbers<[1], [0], [0], [1], [0, 0, 1, 1], [], []>} : vector<8x4xf32>, vector<4x16xf32>, vector<8x16xf32> -> vector<8x16xf32>
    %c0_5 = arith.constant 0 : index
    %c0_6 = arith.constant 0 : index
    %6 = vector.load %arg4[%c0_5, %c0_6] : memref<8x1xf32, #tpu.memory_space<vmem>>, vector<8x1xf32>
    %7 = vector.broadcast %6 : vector<8x1xf32> to vector<8x16xf32>
    %8 = arith.addf %5, %7 : vector<8x16xf32>
    %c0_7 = arith.constant 0 : index
    %c0_8 = arith.constant 0 : index
    %c0_9 = arith.constant 0 : index
    %9 = vector.load %arg5[%c0_7, %c0_8, %c0_9] : memref<1x8x16xf32, #tpu.memory_space<vmem>>, vector<1x8x16xf32>
    %10 = vector.shape_cast %9 : vector<1x8x16xf32> to vector<8x16xf32>
    %11 = vector.shape_cast %8 : vector<8x16xf32> to vector<1x8x16xf32>
    tpu.vector_store %arg5[%c0_7, %c0_8, %c0_9], %11 {strides = array<i32>} : memref<1x8x16xf32, #tpu.memory_space<vmem>>, vector<1x8x16xf32>,
    return
  }
  func.func @transform_0(%arg0: i32, %arg1: i32) -> (i32, i32, i32) {
    %c0_i32 = arith.constant 0 : i32
    %c0_i32_0 = arith.constant 0 : i32
    return %arg0, %c0_i32, %arg1 : i32, i32, i32
  }
  func.func @transform_1(%arg0: i32, %arg1: i32) -> (i32, i32, i32) {
    %c0_i32 = arith.constant 0 : i32
    %c0_i32_0 = arith.constant 0 : i32
    %c0_i32_1 = arith.constant 0 : i32
    %c0_i32_2 = arith.constant 0 : i32
    return %c0_i32, %c0_i32_0, %c0_i32_1 : i32, i32, i32
  }
  func.func @transform_2(%arg0: i32, %arg1: i32) -> (i32, i32) {
    %c0_i32 = arith.constant 0 : i32
    %c0_i32_0 = arith.constant 0 : i32
    %c0_i32_1 = arith.constant 0 : i32
    return %c0_i32, %c0_i32_0 : i32, i32
  }
  func.func @transform_3(%arg0: i32, %arg1: i32) -> (i32, i32, i32) {
    %c0_i32 = arith.constant 0 : i32
    %c0_i32_0 = arith.constant 0 : i32
    return %arg0, %c0_i32, %arg1 : i32, i32, i32
  }
}

</mosaic_0001>

<bundles_post_ra>
// kernel: tpu_custom_call.1
= control target key start
LH: loop header
LB: loop body
LE: loop exit
PB: predicated region body
PF: predicated region fallthrough
CT: control target
= control target key end

     0   :  { %8 = vsyncpa [#allocation3], 0  ;;  %s666_s0 = inlined_call_operand.vmem [shape: f32[2,4,16], index: 0, kind: input, shape index: {}]   ;;  %s667_s1 = inlined_call_operand.vmem [shape: f32[1,8,4], index: 1, kind: input, shape index: {}]   ;;  %s668_s2 = inlined_call_operand.vmem [shape: f32[8,1], index: 2, kind: input, shape index: {}]   ;;  %s669_s3 = inlined_call_operand.hbm [shape: f32[2,8,16], index: 3, kind: output, shape index: {}]  }
   0x1   :  { %10 = vsyncpa [#allocation3 + $0x1], 0  ;;  %s548_s12 = smov 0   ;;  %s550_s13 = smov 0  }
   0x2   :  { %s552_s14 = smov 0   ;;  %s554_s15 = smov 0  }
   0x3   :  { %s556_s16 = smov 0   ;;  %s558_s17 = smov 0  }
   0x4 LB: > { %s365_s18 = sadd.s32 4294967295, %s522_s17   ;;  %s366_s19 = sadd.s32 4294967294, %s522_s17   ;;  %s522_s17 = sphi %s558_s17, %s16_s17   ;;  %s518_s16 = sphi %s556_s16, %s676_s16   ;;  %s514_s15 = sphi %s554_s15, %s675_s15   ;;  %s510_s14 = sphi %s552_s14, %s674_s14   ;;  %s506_s13 = sphi %s550_s13, %s673_s13   ;;  %s502_s12 = sphi %s548_s12, %s672_s12  }
   0x5   : > { %s28_s20 = sadd.s32 1, %s518_s16  ;;  %s107_s21 = sadd.s32 1, %s510_s14 }
   0x6   : > { %p30_p0 = scmp.ge.s32.totalorder %s28_s20, 2  ;;  %p117_p1 = scmp.ne.s32.totalorder %s510_s14, %s506_s13 }
   0x7   : > { %p118_p2 = scmp.eq.s32.totalorder %s365_s18, 1  ;;  %p123_p3 = scmp.ne.s32.totalorder %s506_s13, %s502_s12 }
   0x8   : > { %s678_s20 = smov (%p30_p0, %s28_s20), 0  ;;  %p124_p5 = scmp.eq.s32.totalorder %s366_s19, 1 }
   0x9   : > { %p588_p4 = por %p118_p2, %p117_p1  ;;  %s102_s23 = ssub.s32 %s518_s16, %s678_s20 }
   0xa   : > { %p369_p6 = scmp.ge.s32.totalorder %s522_s17, 1  ;;  %p105_p7 = scmp.eq.s32.totalorder %s102_s23, 0 }
   0xb   : > { %p595_p8 = por %p124_p5, %p123_p3  ;;  %p158_p9 = scmp.lt.s32.totalorder %s522_s17, 3 }
   0xc   : > { %s601_s25 = scalar_select %p105_p7, %s510_s14, %s107_s21  }
   0xd   : > { %p159_p10 = pnand %p369_p6, %p158_p9 }
   0xe   : > { %p184_p11 = scmp.lt.s32.totalorder (!%p159_p10), %s514_s15, 1  ;;  %v524_v0 = vmov (!%p159_p10), 0.0   ;;  %vm525_vm0 = vmmov (!%p159_p10), 0   ;;  %v193_v1 = vld [vmem:[%s668_s2] sm:$0xff] (!%p159_p10)  ;;  %v526_v2 = vmov (!%p159_p10), 0   ;;  %vm203_vm1 = vcmask (!%p159_p10), 1043456  }
   0xf   : > { %162 = sbr.rel (%p159_p10) target bundleno = 256 (0x100), region = 32  ;;  %380 = vmatprep.subr.mxu0 (!%p159_p10), %v524_v0  ;;  %382 = vmatprep.mubr.msk.f32.mxu0 (!%p159_p10), %vm525_vm0, %v524_v0  ;;  %v192_v3 = vld [vmem:[%s667_s1] sm:$0xff] (!%p159_p10)  ;;  %vm199_vm2 = vcmask (!%p159_p10), 31744   ;;  %s181_s8 = sand.u32 (!%p159_p10), 1, %s506_s13   ;;  %vm277_vm3 = vcmask (!%p159_p10), 130048  }
  0x10   : > { %443 = vset.pattern.permute.xlu0 (!%p159_p10), %v526_v2  ;;  %s370_s9 = sshll.u32 (!%p159_p10), %s181_s8, 3  ;;  %s375_s10 = sshll.u32 (!%p159_p10), %s514_s15, 7 }
  0x11   : > { %196 = vperm.xlu0 (!%p159_p10), %443, %v193_v1   ;;  %s183_s11 = scalar_lea.vmem (!%p159_p10), [#allocation2], %s370_s9  ;;  %s619_s23 = scalar_lea.hbm (!%p159_p10), %s669_s3, %s375_s10 }
  0x12   : > { %s294_s18 = sshll.u32 (!%p159_p10), %s183_s11, 4  ;;  %s280_s26 = scalar_lea.sflag (!%p159_p10), [#allocation3], %s181_s8  ;;  %s621_s18 = int_to_ptr.vmem [resolvable:$true] %s294_s18 }
  0x13   : > { %s444_s27 = scalar_lea.vmem (!%p159_p10), %s621_s18, 128 }
  0x14   : > { %p445_p12 = scmp.ne.s32.totalorder (!%p159_p10), %s621_s18, %s444_s27 }
  0x16   : > { %s185_s28 = scalar_select %p184_p11, %s514_s15, 1 }
  0x17   : > { %p446_p13 = pnand %p445_p12, %p588_p4  ;;  %s527_s15 = smov [#allocation2]  }
  0x18   : > { %s371_s29 = sshll.u32 %s185_s28, 2  ;;  %s448_s28 = sshll.u32 %s527_s15, 4  ;;  %s449_s28 = int_to_ptr.vmem [resolvable:$false] %s448_s28 }
  0x19   : > { %s190_s5 = scalar_lea.vmem %s666_s0, %s371_s29  ;;  %p447_p0 = pneg %p446_p13 }
  0x1a   : > { %v191_v4 = vld [vmem:[%s190_s5] sm:$0xf]  ;;  %s450_s29 = scalar_lea.vmem %s449_s28, 256  ;;  %p451_p1 = scmp.lt.s32.totalorder %s621_s18, %s449_s28 }
  0x1b   : > { %381 = vmatpush3.msk.msra.mxu0 %vm203_vm1, %v191_v4  ;;  %p452_p2 = scmp.lt.s32.totalorder %s450_s29, %s444_s27 }
  0x1c   : > { %383 = vmatmul.mubr.msk.f32.vlgmr.msra.gmra.mrb[0].mxu0 %vm199_vm2, %v192_v3 }
  0x1d   : > { %p453_p3 = por %p452_p2, %p451_p1 }
  0x1f   : > { %p454_p5 = pnand %p453_p3, %p447_p0 }
  0x90   : > { %v197_v5 = vpop.permute.xlu0 %196 }
  0xef   : > { %v273_v6 = vpop.f32.mrb[0].mxu0 }
  0xf0   : > { %v274_v7 = vadd.f32 %v273_v6, %v197_v5  ;;  %v384_v8 = vpop.f32.mrb[1].mxu0 }
  0xf2   : > { %278 = vst.msk [vmem:[%s183_s11] sm:$0xff] %vm277_vm3, %v274_v7 }
  0xf3   : > { %457 = shalt.err (!%p454_p5)
}
  0xf4   : > { %s458_s30 = scalar_lea.hbm %s619_s23, 128  ;;  %s462_s6 = scalar_lea.hbm %s669_s3, 256 }
  0xf5   : > { %p459_p6 = scmp.ne.s32.totalorder %s619_s23, %s458_s30  ;;  %p463_p10 = scmp.lt.u32.totalorder %s619_s23, %s669_s3 }
  0xf6   : > { %p464_p11 = scmp.lt.u32.totalorder %s462_s6, %s458_s30  ;;  %p466_p13 = scmp.lt.u32.totalorder %s458_s30, %s619_s23 }
  0xf7   : > { %p460_p7 = pnand %p459_p6, %p588_p4 }
  0xf8   : > { %p465_p12 = por %p464_p11, %p463_p10 }
  0xf9   : > { %p461_p9 = pneg %p460_p7 }
  0xfa   : > { %p467_p0 = por %p466_p13, %p465_p12 }
  0xfc   : > { %p468_p1 = pnand %p467_p0, %p461_p9 }
  0xfe   : > { %471 = shalt.err (!%p468_p1)
}
  0xff   : > { %385 = dma.vmem_to_hbm [thread:$0]  (%p588_p4), %s621_s18, 128, %s619_s23, %s280_s26  }
 0x100 PF: > { %p391_p2 = scmp.ge.s32.totalorder %s522_s17, 2  ;;  %s306_s9 = sand.u32 1, %s502_s12  }
 0x101   : > { %s307_s10 = scalar_lea.sflag [#allocation3], %s306_s9 }
 0x102   : > { %p388_p3 = pnand %p391_p2, %p595_p8 }
 0x104   : > { %497 = dma.done.wait (!%p388_p3), %s307_s10, 128  }
 0x105   : > { %499 = vsyncadd (!%p388_p3), %s307_s10, 4294967168  ;;  %s16_s17 = sadd.s32 1, %s522_s17   ;;  %s672_s12 = smov %s506_s13 }
 0x106   : > { %p13_p5 = scmp.ge.s32.totalorder %s16_s17, 4   ;;  %s673_s13 = smov %s510_s14 }
 0x107   : > { %s674_s14 = smov %s601_s25  ;;  %s675_s15 = smov %s518_s16 }
 0x108   : > { %s676_s16 = smov %s678_s20  ;;  %15 = sbr.rel (!%p13_p5) target bundleno = 4 (0x4), region = 67 }
 0x10f   :  { %312 = vsyncpa [#allocation3], 1 }
 0x110   :  { %314 = vsyncpa [#allocation3 + $0x1], 1 }

</bundles_post_ra>
